<compile_context>
chip_gen: v5e
topology: v5e:2x2
jax: 0.10.0
libtpu: 0.0.40
codegen_flags: <defaults>
</compile_context>

<pallas_src>
import functools

import jax
import jax.numpy as jnp
from jax import lax
from jax.experimental import pallas as pl
from jax.experimental.pallas import tpu as pltpu

LANES = 128
SUBLANES = 8
ROW_ALIGN = 32                      # bf16/int8 sublane packing friendly
MAX_ROW_TILE = 8192                 # 8192 x 128 f32 = 4 MiB per input block
VMEM_LIMIT_BYTES = 48 * 1024 * 1024  # < 64 MiB physical on v7x, safe everywhere


def _round_up(x, m):
    return ((x + m - 1) // m) * m


def _cdiv(a, b):
    return -(-a // b)


def _choose_row_tile(rows):
    """Row tile: multiple of 8 (32 for larger tensors), big enough to amortize
    per-grid-step overhead, small enough to give >=2 blocks for megacore."""
    if rows <= 64:
        return _round_up(rows, SUBLANES)
    half = _round_up(_cdiv(rows, 2), ROW_ALIGN)
    return min(MAX_ROW_TILE, half)


def _static_int_pow(v, g):
    """Exponentiation by squaring unrolled at trace time (VPU multiplies only)."""
    result = None
    base = v
    while g > 0:
        if g & 1:
            result = base if result is None else result * base
        g >>= 1
        if g:
            base = base * base
    return result if result is not None else jnp.ones_like(v)


def _focal_loss_math(x, t, *, alpha, gamma, from_logits):
    """Element-wise focal loss in f32 (matches the PyTorch reference, including
    the -100 clamp of F.binary_cross_entropy's log terms)."""
    x = x.astype(jnp.float32)
    t = t.astype(jnp.float32)

    if from_logits:
        # z = exp(-|x|) computed once; sigmoid and stable BCE-with-logits share it.
        z = jnp.exp(-jnp.abs(x))
        # approx=False keeps us within 1e-5 of the reference; still cheaper than
        # a generic f32 divide on the EUP.
        inv = pl.reciprocal(1.0 + z, approx=False)
        p = jnp.where(x >= 0.0, inv, z * inv)  # == sigmoid(x)
        ce = jnp.maximum(x, 0.0) - x * t + jnp.log1p(z)
    else:
        p = x
        log_p = jnp.maximum(jnp.log(p), -100.0)
        log_1mp = jnp.maximum(jnp.log(1.0 - p), -100.0)
        ce = -(t * log_p + (1.0 - t) * log_1mp)

    p_t = p * t + (1.0 - p) * (1.0 - t)
    one_minus_pt = 1.0 - p_t

    gamma_f = float(gamma)
    if gamma_f.is_integer() and 0.0 <= gamma_f <= 32.0:
        modulator = _static_int_pow(one_minus_pt, int(gamma_f))
    else:
        modulator = one_minus_pt ** gamma_f  # general float exponent

    loss = ce * modulator
    if alpha >= 0:
        alpha_t = alpha * t + (1.0 - alpha) * (1.0 - t)
        loss = alpha_t * loss
    return loss


def _focal_loss_kernel(x_ref, t_ref, o_ref, *, alpha, gamma, from_logits):
    loss = _focal_loss_math(x_ref[...], t_ref[...],
                            alpha=alpha, gamma=gamma, from_logits=from_logits)
    o_ref[...] = loss.astype(o_ref.dtype)


def _focal_loss_sum_kernel(x_ref, t_ref, out_ref, *,
                           alpha, gamma, from_logits,
                           blocks_per_split, last_block,
                           n_full_rows, rem, row_tile):
    i = pl.program_id(0)           # megacore split index
    k = pl.program_id(1)           # block index within the split
    g = i * blocks_per_split + k   # logical global block index (may overshoot)

    @pl.when(k == 0)
    def _init():
        out_ref[...] = jnp.zeros_like(out_ref)

    loss = _focal_loss_math(x_ref[...], t_ref[...],
                            alpha=alpha, gamma=gamma, from_logits=from_logits)
    sub = row_tile // SUBLANES

    # Fast path: fully-valid block, plain VPU sublane-fold + accumulate.
    @pl.when(g < last_block)
    def _accumulate_fast():
        out_ref[...] += loss.reshape(sub, SUBLANES, LANES).sum(axis=0)

    # Last logical block (possibly ragged) and the at-most-one duplicate block
    # produced when the block count is odd (its index_map is clamped): mask
    # AFTER the loss computation so garbage never reaches the accumulator.
    @pl.when(g >= last_block)
    def _accumulate_masked():
        row_idx = lax.broadcasted_iota(jnp.int32, loss.shape, 0)
        col_idx = lax.broadcasted_iota(jnp.int32, loss.shape, 1)
        grow = g * row_tile + row_idx
        valid = (grow < n_full_rows) | ((grow == n_full_rows) & (col_idx < rem))
        masked = jnp.where(valid, loss, 0.0)
        out_ref[...] += masked.reshape(sub, SUBLANES, LANES).sum(axis=0)


def focal_loss_pallas(inputs, targets, alpha=0.25, gamma=2.0,
                      reduction="none", from_logits=False):
    if reduction not in ("none", "mean", "sum"):
        raise ValueError(
            f"Invalid Value for arg 'reduction': '{reduction}' "
            "\n Supported reduction modes: 'none', 'mean', 'sum'")
    assert inputs.shape == targets.shape
    orig_shape = inputs.shape
    orig_dtype = inputs.dtype
    n = int(inputs.size)

    if n == 0:
        if reduction == "none":
            return jnp.zeros(orig_shape, orig_dtype)
        if reduction == "sum":
            return jnp.zeros((), orig_dtype)
        return jnp.full((), jnp.nan, orig_dtype)

    x = inputs.reshape(-1)
    t = targets.reshape(-1)
    if n % LANES == 0:
        rows = n // LANES                     # zero-copy lane-dense layout
    else:
        rows = _round_up(_cdiv(n, LANES), ROW_ALIGN)
        pad = rows * LANES - n                # small pad; fuses into the call
        x = jnp.pad(x, (0, pad))
        t = jnp.pad(t, (0, pad))
    x2d = x.reshape(rows, LANES)
    t2d = t.reshape(rows, LANES)

    row_tile = _choose_row_tile(rows)
    nblocks = _cdiv(rows, row_tile)
    math_kw = dict(alpha=float(alpha), gamma=float(gamma),
                   from_logits=bool(from_logits))

    if reduction == "none":
        in_spec = pl.BlockSpec((row_tile, LANES), lambda i: (i, 0))
        out2d = pl.pallas_call(
            functools.partial(_focal_loss_kernel, **math_kw),
            out_shape=jax.ShapeDtypeStruct((rows, LANES), orig_dtype),
            grid_spec=pl.GridSpec(
                grid=(nblocks,),
                in_specs=[in_spec, in_spec],
                out_specs=pl.BlockSpec((row_tile, LANES), lambda i: (i, 0)),
            ),
            compiler_params=pltpu.CompilerParams(
                dimension_semantics=("parallel",),
                vmem_limit_bytes=VMEM_LIMIT_BYTES,
                allow_input_fusion=[True, True],
            ),
        )(x2d, t2d)
        if rows * LANES == n:
            return out2d.reshape(orig_shape)
        return out2d.reshape(-1)[:n].reshape(orig_shape)

    # Fused sum / mean: never materialize the full loss tensor in HBM.
    num_splits = 2 if nblocks >= 2 else 1     # 2 TCs on v7x; harmless elsewhere
    bpc = _cdiv(nblocks, num_splits)
    last_block = nblocks - 1

    # Clamp the block index so the (at most one) overshoot block of an odd
    # block count stays in bounds; its contribution is masked to zero in-kernel.
    in_spec = pl.BlockSpec(
        (row_tile, LANES),
        lambda i, k: (jnp.minimum(i * bpc + k, last_block), 0))

    partials = pl.pallas_call(
        functools.partial(_focal_loss_sum_kernel,
                          blocks_per_split=bpc, last_block=last_block,
                          n_full_rows=n // LANES, rem=n % LANES,
                          row_tile=row_tile, **math_kw),
        out_shape=jax.ShapeDtypeStruct((num_splits * SUBLANES, LANES), jnp.float32),
        grid_spec=pl.GridSpec(
            grid=(num_splits, bpc),
            in_specs=[in_spec, in_spec],
            out_specs=pl.BlockSpec((SUBLANES, LANES), lambda i, k: (i, 0)),
        ),
        compiler_params=pltpu.CompilerParams(
            dimension_semantics=("parallel", "arbitrary"),
            vmem_limit_bytes=VMEM_LIMIT_BYTES,
            allow_input_fusion=[True, True],
        ),
    )(x2d, t2d)

    total = jnp.sum(partials, dtype=jnp.float32)
    if reduction == "sum":
        return total.astype(orig_dtype)
    return (total / float(n)).astype(orig_dtype)  # mean


class FocalLoss:
    """JAX/Pallas counterpart of the PyTorch FocalLoss module (no parameters)."""

    def __init__(self, alpha=0.25, gamma=2, reduction="none", from_logits=False):
        self.alpha = alpha
        self.gamma = gamma
        self.reduction = reduction
        self.from_logits = from_logits

    def __call__(self, inputs, targets):
        return focal_loss_pallas(inputs, targets, self.alpha, self.gamma,
                                 self.reduction, self.from_logits)


def _reference_focal_loss(inputs, targets, alpha=0.25, gamma=2.0,
                          reduction="none", from_logits=False):
    inputs = inputs.astype(jnp.float32)
    targets = targets.astype(jnp.float32)
    if from_logits:
        p = jax.nn.sigmoid(inputs)
        ce = (jnp.maximum(inputs, 0.0) - inputs * targets
              + jnp.log1p(jnp.exp(-jnp.abs(inputs))))
    else:
        p = inputs
        ce = -(targets * jnp.maximum(jnp.log(inputs), -100.0)
               + (1.0 - targets) * jnp.maximum(jnp.log(1.0 - inputs), -100.0))
    p_t = p * targets + (1.0 - p) * (1.0 - targets)
    loss = ce * (1.0 - p_t) ** gamma
    if alpha >= 0:
        alpha_t = alpha * targets + (1.0 - alpha) * (1.0 - targets)
        loss = alpha_t * loss
    if reduction == "mean":
        return jnp.mean(loss)
    if reduction == "sum":
        return jnp.sum(loss)
    return loss


if __name__ == "__main__":
    key = jax.random.PRNGKey(0)
    k1, k2, k3 = jax.random.split(key, 3)

    # Detection-style shape: 2*4*16*16 = 2048 elements -> aligned zero-copy path.
    shape = (2, 4, 16, 16)
    probs = jax.random.uniform(k1, shape, dtype=jnp.float32,
                               minval=0.01, maxval=0.99)
    targets = (jax.random.uniform(k2, shape) > 0.5).astype(jnp.float32)

    m_none = FocalLoss(alpha=0.25, gamma=2, reduction="none", from_logits=False)
    out = jax.block_until_ready(m_none(probs, targets))
    ref = _reference_focal_loss(probs, targets, 0.25, 2.0, "none", False)
    assert out.shape == shape
    assert jnp.allclose(out, ref, atol=1e-5, rtol=1e-5), "none/probs mismatch"

    # from_logits path.
    logits = jax.random.normal(k3, shape, dtype=jnp.float32)
    m_lg = FocalLoss(alpha=0.25, gamma=2, reduction="none", from_logits=True)
    out_lg = jax.block_until_ready(m_lg(logits, targets))
    ref_lg = _reference_focal_loss(logits, targets, 0.25, 2.0, "none", True)
    assert jnp.allclose(out_lg, ref_lg, atol=1e-5, rtol=1e-5), "none/logits mismatch"

    # Unaligned tiny shape: padding path + single ragged block + masked reduction.
    shape2 = (3, 5, 7)
    logits2 = jax.random.normal(k1, shape2, dtype=jnp.float32)
    targets2 = (jax.random.uniform(k2, shape2) > 0.5).astype(jnp.float32)
    for red in ("sum", "mean", "none"):
        m = FocalLoss(alpha=0.25, gamma=2, reduction=red, from_logits=True)
        got = jax.block_until_ready(m(logits2, targets2))
        want = _reference_focal_loss(logits2, targets2, 0.25, 2.0, red, True)
        assert got.shape == want.shape, red
        assert jnp.allclose(got, want, atol=1e-5, rtol=1e-5), f"{red} mismatch"

    # Mid-size unaligned shape: multi-block grid, 2-way reduction split,
    # ragged last block handled by masked edge stores / in-kernel mask.
    shape3 = (4, 3, 50, 50)  # 30000 elements, not a multiple of 128
    logits3 = jax.random.normal(k3, shape3, dtype=jnp.float32)
    targets3 = (jax.random.uniform(k1, shape3) > 0.5).astype(jnp.float32)
    for red in ("sum", "mean", "none"):
        m = FocalLoss(alpha=0.25, gamma=2, reduction=red, from_logits=True)
        got = jax.block_until_ready(m(logits3, targets3))
        want = _reference_focal_loss(logits3, targets3, 0.25, 2.0, red, True)
        assert got.shape == want.shape, red
        assert jnp.allclose(got, want, atol=1e-5, rtol=1e-5), f"mid {red} mismatch"

    probs3 = jax.random.uniform(k2, shape3, dtype=jnp.float32,
                                minval=0.01, maxval=0.99)
    m_mean = FocalLoss(alpha=0.25, gamma=2, reduction="mean", from_logits=False)
    got = jax.block_until_ready(m_mean(probs3, targets3))
    want = _reference_focal_loss(probs3, targets3, 0.25, 2.0, "mean", False)
    assert jnp.allclose(got, want, atol=1e-5, rtol=1e-5), "mid mean/probs mismatch"

    print("KERNEL_OK")
</pallas_src>

<mosaic_0001>
module attributes {stable_mosaic.version = 11 : i64} {
  func.func @_focal_loss_kernel(%arg0: i32, %arg1: memref<16x128xf32, #tpu.memory_space<vmem>>, %arg2: memref<16x128xf32, #tpu.memory_space<vmem>>, %arg3: memref<16x128xf32, #tpu.memory_space<vmem>>) attributes {dimension_semantics = [#tpu.dimension_semantics<parallel>], iteration_bounds = array<i64: 1>, scalar_prefetch = 0 : i64, scratch_operands = 0 : i64, tpu.core_type = #tpu.core_type<tc>, window_params = [{transform_indices = @transform_0, window_bounds = array<i64: 16, 128>}, {transform_indices = @transform_1, window_bounds = array<i64: 16, 128>}, {transform_indices = @transform_2, window_bounds = array<i64: 16, 128>}]} {
    %c0 = arith.constant 0 : index
    %c0_0 = arith.constant 0 : index
    %0 = vector.load %arg1[%c0, %c0_0] : memref<16x128xf32, #tpu.memory_space<vmem>>, vector<16x128xf32>
    %c0_1 = arith.constant 0 : index
    %c0_2 = arith.constant 0 : index
    %1 = vector.load %arg2[%c0_1, %c0_2] : memref<16x128xf32, #tpu.memory_space<vmem>>, vector<16x128xf32>
    %2 = math.log %0 : vector<16x128xf32>
    %cst = arith.constant -1.000000e+02 : f32
    %3 = vector.broadcast %cst : f32 to vector<16x128xf32>
    %4 = arith.maximumf %2, %3 : vector<16x128xf32>
    %cst_3 = arith.constant 1.000000e+00 : f32
    %5 = vector.broadcast %cst_3 : f32 to vector<16x128xf32>
    %6 = arith.subf %5, %0 : vector<16x128xf32>
    %7 = math.log %6 : vector<16x128xf32>
    %cst_4 = arith.constant -1.000000e+02 : f32
    %8 = vector.broadcast %cst_4 : f32 to vector<16x128xf32>
    %9 = arith.maximumf %7, %8 : vector<16x128xf32>
    %10 = arith.mulf %1, %4 : vector<16x128xf32>
    %cst_5 = arith.constant 1.000000e+00 : f32
    %11 = vector.broadcast %cst_5 : f32 to vector<16x128xf32>
    %12 = arith.subf %11, %1 : vector<16x128xf32>
    %13 = arith.mulf %12, %9 : vector<16x128xf32>
    %14 = arith.addf %10, %13 : vector<16x128xf32>
    %cst_6 = arith.constant 0.000000e+00 : f32
    %15 = vector.broadcast %cst_6 : f32 to vector<16x128xf32>
    %16 = arith.subf %15, %14 : vector<16x128xf32>
    %17 = arith.mulf %0, %1 : vector<16x128xf32>
    %cst_7 = arith.constant 1.000000e+00 : f32
    %18 = vector.broadcast %cst_7 : f32 to vector<16x128xf32>
    %19 = arith.subf %18, %0 : vector<16x128xf32>
    %cst_8 = arith.constant 1.000000e+00 : f32
    %20 = vector.broadcast %cst_8 : f32 to vector<16x128xf32>
    %21 = arith.subf %20, %1 : vector<16x128xf32>
    %22 = arith.mulf %19, %21 : vector<16x128xf32>
    %23 = arith.addf %17, %22 : vector<16x128xf32>
    %cst_9 = arith.constant 1.000000e+00 : f32
    %24 = vector.broadcast %cst_9 : f32 to vector<16x128xf32>
    %25 = arith.subf %24, %23 : vector<16x128xf32>
    %26 = arith.mulf %25, %25 : vector<16x128xf32>
    %27 = arith.mulf %16, %26 : vector<16x128xf32>
    %cst_10 = arith.constant 2.500000e-01 : f32
    %28 = vector.broadcast %cst_10 : f32 to vector<16x128xf32>
    %29 = arith.mulf %28, %1 : vector<16x128xf32>
    %cst_11 = arith.constant 1.000000e+00 : f32
    %30 = vector.broadcast %cst_11 : f32 to vector<16x128xf32>
    %31 = arith.subf %30, %1 : vector<16x128xf32>
    %cst_12 = arith.constant 7.500000e-01 : f32
    %32 = vector.broadcast %cst_12 : f32 to vector<16x128xf32>
    %33 = arith.mulf %32, %31 : vector<16x128xf32>
    %34 = arith.addf %29, %33 : vector<16x128xf32>
    %35 = arith.mulf %34, %27 : vector<16x128xf32>
    %c0_13 = arith.constant 0 : index
    %c0_14 = arith.constant 0 : index
    %36 = vector.load %arg3[%c0_13, %c0_14] : memref<16x128xf32, #tpu.memory_space<vmem>>, vector<16x128xf32>
    tpu.vector_store %arg3[%c0_13, %c0_14], %35 {strides = array<i32>} : memref<16x128xf32, #tpu.memory_space<vmem>>, vector<16x128xf32>,
    return
  }
  func.func @transform_0(%arg0: i32) -> (i32, i32) {
    %c0_i32 = arith.constant 0 : i32
    %c0_i32_0 = arith.constant 0 : i32
    return %arg0, %c0_i32 : i32, i32
  }
  func.func @transform_1(%arg0: i32) -> (i32, i32) {
    %c0_i32 = arith.constant 0 : i32
    %c0_i32_0 = arith.constant 0 : i32
    return %arg0, %c0_i32 : i32, i32
  }
  func.func @transform_2(%arg0: i32) -> (i32, i32) {
    %c0_i32 = arith.constant 0 : i32
    %c0_i32_0 = arith.constant 0 : i32
    return %arg0, %c0_i32 : i32, i32
  }
}

</mosaic_0001>

<bundles_post_ra>
// kernel: tpu_custom_call.1
= control target key start
LH: loop header
LB: loop body
LE: loop exit
PB: predicated region body
PF: predicated region fallthrough
CT: control target
= control target key end

     0   :  { %7 = vsyncpa [#allocation3], 0  ;;  %s243_s0 = inlined_call_operand.hbm [shape: f32[16,128], index: 0, kind: input, shape index: {}]   ;;  %s244_s1 = inlined_call_operand.hbm [shape: f32[16,128], index: 1, kind: input, shape index: {}]   ;;  %s245_s2 = inlined_call_operand.hbm [shape: f32[16,128], index: 2, kind: output, shape index: {}]  }
   0x1   :  { %8 = vsyncpa [#allocation6], 0 }
   0x2   :  { %9 = vsyncpa [#allocation4], 0  ;;  %s14_s11 = sshll.u32 %s243_s0, 4  ;;  %s205_s12 = smov [#allocation2]   ;;  %s15_s11 = int_to_ptr.hbm [resolvable:$true] %s14_s11 }
   0x3   :  { %s16_s13 = sshll.u32 %s205_s12, 4  ;;  %s27_s16 = sshll.u32 %s244_s1, 4  ;;  %s17_s13 = int_to_ptr.vmem [resolvable:$true] %s16_s13  ;;  %s28_s16 = int_to_ptr.hbm [resolvable:$true] %s27_s16 }
   0x4   :  { %s206_s17 = smov 128   ;;  %s207_s18 = smov 8  }
   0x5   :  { %22 = dma.hbm_to_vmem [thread:$0]  %s15_s11, 256, %s17_s13, [#allocation3], %s206_s17, %s206_s17, %s207_s18  }
   0x6   :  { %s208_s19 = smov [#allocation5]  }
   0x7   :  { %s29_s20 = sshll.u32 %s208_s19, 4  ;;  %s30_s20 = int_to_ptr.vmem [resolvable:$true] %s29_s20 }
   0x8   :  { %35 = dma.hbm_to_vmem [thread:$0]  %s28_s16, 256, %s30_s20, [#allocation6], %s206_s17, %s206_s17, %s207_s18  }
   0x9   :  { %199 = dma.done.wait [#allocation3], 256  }
   0xa   :  { %200 = vsyncadd [#allocation3], 4294967040 }
   0xb   :  { %201 = dma.done.wait [#allocation6], 256  }
   0xc   :  { %202 = vsyncadd [#allocation6], 4294967040  ;;  %v44_v0 = vld [vmem:[#allocation2] sm:$0xff]  ;;  %v46_v1 = vld [vmem:[#allocation5] sm:$0xff]  ;;  %s209_s0 = smov [#allocation7]   ;;  %s100_s23 = sshll.u32 %s245_s2, 4  ;;  %s101_s23 = int_to_ptr.hbm [resolvable:$true] %s100_s23 }
   0xd   :  { %v45_v2 = vld [vmem:[#allocation2 + $0x8] sm:$0xff]  ;;  %119 = vlog2.f32 %v44_v0  ;;  %v54_v3 = vsub.f32 1.0, %v44_v0  ;;  %v64_v4 = vsub.f32 1.0, %v46_v1  ;;  %v47_v5 = vld [vmem:[#allocation5 + $0x8] sm:$0xff]  ;;  %v72_v8 = vmul.f32 %v46_v1, %v44_v0  ;;  %s98_s1 = sshll.u32 %s209_s0, 4  ;;  %s99_s1 = int_to_ptr.vmem [resolvable:$true] %s98_s1 }
   0xe   :  { %121 = vlog2.f32 %v45_v2  ;;  %v55_v6 = vsub.f32 1.0, %v45_v2  ;;  %v65_v7 = vsub.f32 1.0, %v47_v5  ;;  %v73_v10 = vmul.f32 %v47_v5, %v45_v2 }
   0xf   :  { %123 = vlog2.f32 %v54_v3  ;;  %v74_v9 = vmul.f32 %v64_v4, %v54_v3  ;;  %v84_v31 = vmul.f32 0.25, %v46_v1  ;;  %v86_v32 = vmul.f32 0.75, %v64_v4 }
  0x10   :  { %125 = vlog2.f32 %v55_v6  ;;  %v75_v11 = vmul.f32 %v65_v7, %v55_v6  ;;  %v85_v34 = vmul.f32 0.25, %v47_v5  ;;  %v87_v35 = vmul.f32 0.75, %v65_v7 }
  0x11   :  { %v76_v15 = vadd.f32 %v74_v9, %v72_v8  ;;  %v88_v41 = vadd.f32 %v86_v32, %v84_v31 }
  0x12   :  { %v77_v18 = vadd.f32 %v75_v11, %v73_v10  ;;  %v89_v43 = vadd.f32 %v87_v35, %v85_v34 }
  0x13   :  { %v120_v12 = vpop.eup %119  ;;  %v78_v26 = vsub.f32 1.0, %v76_v15 }
  0x14   :  { %v122_v13 = vpop.eup %121  ;;  %v49_v14 = vmul.f32 0.6931472, %v120_v12  ;;  %v79_v29 = vsub.f32 1.0, %v77_v18 }
  0x15   :  { %v124_v16 = vpop.eup %123  ;;  %v51_v17 = vmul.f32 0.6931472, %v122_v13  ;;  %v80_v37 = vmul.f32 %v78_v26, %v78_v26 }
  0x16   :  { %v126_v19 = vpop.eup %125  ;;  %v52_v20 = vmax.f32 %v49_v14, -100.0  ;;  %v57_v21 = vmul.f32 0.6931472, %v124_v16  ;;  %v81_v39 = vmul.f32 %v79_v29, %v79_v29 }
  0x17   :  { %v53_v22 = vmax.f32 %v51_v17, -100.0  ;;  %v59_v23 = vmul.f32 0.6931472, %v126_v19 }
  0x18   :  { %v60_v24 = vmax.f32 %v57_v21, -100.0  ;;  %v62_v25 = vmul.f32 %v52_v20, %v46_v1 }
  0x19   :  { %v61_v27 = vmax.f32 %v59_v23, -100.0  ;;  %v63_v28 = vmul.f32 %v53_v22, %v47_v5 }
  0x1a   :  { %v66_v30 = vmul.f32 %v64_v4, %v60_v24 }
  0x1b   :  { %v67_v33 = vmul.f32 %v65_v7, %v61_v27 }
  0x1c   :  { %v68_v36 = vadd.f32 %v66_v30, %v62_v25 }
  0x1d   :  { %v69_v38 = vadd.f32 %v67_v33, %v63_v28 }
  0x1e   :  { %v70_v40 = vsub.f32 0.0, %v68_v36 }
  0x1f   :  { %v71_v42 = vsub.f32 0.0, %v69_v38 }
  0x20   :  { %v82_v44 = vmul.f32 %v80_v37, %v70_v40 }
  0x21   :  { %v83_v45 = vmul.f32 %v81_v39, %v71_v42 }
  0x22   :  { %v90_v46 = vmul.f32 %v88_v41, %v82_v44 }
  0x23   :  { %v91_v47 = vmul.f32 %v89_v43, %v83_v45 }
  0x24   :  { %92 = vst [vmem:[#allocation7] sm:$0xff] %v90_v46 }
  0x25   :  { %93 = vst [vmem:[#allocation7 + $0x8] sm:$0xff] %v91_v47 }
  0x26   :  { %106 = dma.vmem_to_hbm [thread:$0]  %s99_s1, 256, %s101_s23, [#allocation4], %s206_s17, %s206_s17, %s207_s18  }
  0x27   :  { %203 = dma.done.wait [#allocation4], 256  }
  0x28   :  { %204 = vsyncadd [#allocation4], 4294967040 }
  0x29   :  { %111 = vsyncpa [#allocation3], 1 }
  0x2a   :  { %112 = vsyncpa [#allocation6], 1 }
  0x2b   :  { %113 = vsyncpa [#allocation4], 1 }

</bundles_post_ra>
